<compile_context>
chip_gen: v7x
topology: tpu7x:2x2x1
jax: 0.10.0
libtpu: 0.0.40
codegen_flags: <defaults>
</compile_context>

<pallas_src>
import functools

import jax
import jax.numpy as jnp
from jax.experimental import pallas as pl
from jax.experimental.pallas import tpu as pltpu

PATCH = 16
TARGET = 0.6


def _exposure_kernel(x_ref, sel_ref, pool_ref, out_ref, *, C, TH, W, H, mask_rows):
    # x_ref   : (1, C, TH, W)  input tile, original dtype (never upcast wholesale)
    # sel_ref : (TH/16, C*TH)  0/1 selection matrix (x.dtype): channel + row pooling
    # pool_ref: (W, W/16)      0/1 block-diagonal matrix (f32): column pooling
    # out_ref : (1, 1, 8, 128) lane-dense slab holding this tile's partial sum
    x3d = x_ref[0]                                             # (C, TH, W)

    if mask_rows:
        # Last H tile may extend past H: zero padded rows so garbage (possibly
        # inf/NaN) cannot pollute the matmul accumulation of valid row-groups.
        rows_left = H - pl.program_id(1) * TH
        ridx = jax.lax.broadcasted_iota(jnp.int32, (TH, W), 0)
        keep = (ridx < rows_left)[None, :, :]                  # (1, TH, W)
        x3d = jnp.where(keep, x3d, jnp.zeros((), x3d.dtype))

    # Free reshape (TH is a multiple of 16, so the sublane merge is tile-aligned).
    x2d = x3d.reshape(C * TH, W)

    # Channel sum + height pooling fused into one MXU matmul (f32 accumulation).
    rp = jnp.dot(sel_ref[...], x2d,
                 preferred_element_type=jnp.float32)           # (TH/16, W)
    # Width pooling on the MXU against the resident block-diagonal ones matrix.
    pooled = jnp.dot(rp, pool_ref[...],
                     preferred_element_type=jnp.float32)       # (TH/16, W/16)

    scale = jnp.float32(1.0 / (C * PATCH * PATCH))
    err = pooled * scale - jnp.float32(TARGET)
    err2 = err * err

    if mask_rows:
        # Exclude row-groups that lie entirely in the padded region.
        rows_left = H - pl.program_id(1) * TH
        valid_groups = jnp.minimum(rows_left, TH) // PATCH
        gidx = jax.lax.broadcasted_iota(jnp.int32, err2.shape, 0)
        err2 = jnp.where(gidx < valid_groups, err2, 0.0)

    out_ref[...] = jnp.broadcast_to(jnp.sum(err2), (1, 1, 8, 128))


def _reference_loss(x: jax.Array) -> jax.Array:
    # Pure-JAX reference mirroring the PyTorch forward.
    B, C, H, W = x.shape
    cm = jnp.mean(x.astype(jnp.float32), axis=1)                         # (B,H,W)
    pm = cm.reshape(B, H // PATCH, PATCH, W // PATCH, PATCH).mean(axis=(2, 4))
    return jnp.mean((pm - jnp.float32(TARGET)) ** 2)


def _vmem_budget():
    """(vmem_limit_bytes, per-call working-set budget) tuned per TPU generation."""
    try:
        cap = pltpu.get_tpu_info().vmem_capacity_bytes
    except Exception:
        cap = 64 * 1024 * 1024            # unknown -> assume the smallest (v7x)
    if cap >= 100 * 1024 * 1024:          # v5e / v6e: 128 MiB physical VMEM
        limit = 64 * 1024 * 1024
    else:                                 # v7x: 64 MiB physical VMEM
        limit = 48 * 1024 * 1024
    return limit, int(limit * 0.85)


def _estimate_vmem(C, th, W, itemsize):
    """Conservative VMEM working-set estimate for one grid step (double-buffered)."""
    in_tile = C * th * W * itemsize                 # input tile
    sel = (th // PATCH) * C * th * itemsize         # selection matrix
    pool = W * (W // PATCH) * 4                     # column-pooling matrix (f32)
    rp = (th // PATCH) * W * 4                      # f32 matmul intermediate
    out = 8 * 128 * 4                               # output slab
    return 2 * (in_tile + sel + pool + rp + out)


def exposure_control_loss(x: jax.Array, *, use_pallas=None) -> jax.Array:
    """x: (B, C, H, W). Returns scalar f32 loss identical to the PyTorch module."""
    B, C, H, W = x.shape
    assert H % PATCH == 0 and W % PATCH == 0, "H, W must be multiples of patch_size"

    # Tiny spatial sizes are equally well served by plain XLA fusion.
    if use_pallas is None:
        use_pallas = (H * W) >= 128 * 128
    if not use_pallas:
        return _reference_loss(x)

    vmem_limit, budget = _vmem_budget()
    itemsize = jnp.dtype(x.dtype).itemsize

    # Largest TH (multiple of PATCH, <= H) whose working set fits the budget;
    # track the largest exact divisor of H as well (avoids the masked path).
    best_fit, best_div = 0, 0
    for cand in range(PATCH, H + 1, PATCH):
        if _estimate_vmem(C, cand, W, itemsize) <= budget:
            best_fit = cand
            if H % cand == 0:
                best_div = cand
    if best_fit == 0:
        # TODO(synk): add a W-tiling fallback for very large C*W rows; fall back
        # to plain XLA here instead of risking a VMEM OOM (notably v7x's 64 MiB).
        return _reference_loss(x)

    # Prefer an exact divisor unless it is much smaller than the best fit.
    th = best_div if best_div >= max(PATCH, best_fit // 2) else best_fit

    if B == 1:
        # Ensure >= 2 H tiles so both v7x TensorCores get work.
        th = min(th, pl.cdiv(H // PATCH, 2) * PATCH)

    n_h = pl.cdiv(H, th)
    th = pl.cdiv(H // PATCH, n_h) * PATCH          # rebalance tile sizes
    n_h = pl.cdiv(H, th)
    mask_rows = (H % th) != 0

    # Static 0/1 pooling operands, hoisted out of the kernel; their constant
    # index maps keep them VMEM-resident across grid steps.
    r_in_tile = jnp.arange(C * th, dtype=jnp.int32) % th
    sel = (r_in_tile[None, :] // PATCH
           == jnp.arange(th // PATCH, dtype=jnp.int32)[:, None]).astype(x.dtype)
    cols = jnp.arange(W, dtype=jnp.int32)
    pool = (cols[:, None] // PATCH
            == jnp.arange(W // PATCH, dtype=jnp.int32)[None, :]).astype(jnp.float32)

    kernel = functools.partial(_exposure_kernel, C=C, TH=th, W=W, H=H,
                               mask_rows=mask_rows)

    partials = pl.pallas_call(
        kernel,
        out_shape=jax.ShapeDtypeStruct((B, n_h, 8, 128), jnp.float32),
        grid_spec=pltpu.PrefetchScalarGridSpec(
            num_scalar_prefetch=0,
            grid=(B, n_h),
            in_specs=[
                pl.BlockSpec((1, C, th, W), lambda b, i: (b, 0, i, 0)),
                pl.BlockSpec((th // PATCH, C * th), lambda b, i: (0, 0)),
                pl.BlockSpec((W, W // PATCH), lambda b, i: (0, 0)),
            ],
            out_specs=pl.BlockSpec((1, 1, 8, 128), lambda b, i: (b, i, 0, 0)),
        ),
        compiler_params=pltpu.CompilerParams(
            dimension_semantics=("parallel", "parallel"),
            vmem_limit_bytes=vmem_limit,
        ),
    )(x, sel, pool)

    # Each slab holds its tile's scalar broadcast across 8*128 lanes: reduce the
    # whole slab contiguously and divide by the (power-of-two) lane count.
    n_patch_means = B * (H // PATCH) * (W // PATCH)
    total = jnp.sum(partials) * jnp.float32(1.0 / (8 * 128))
    return (total / jnp.float32(n_patch_means)).astype(jnp.float32)


if __name__ == "__main__":
    key = jax.random.PRNGKey(0)
    k1, k2, k3 = jax.random.split(key, 3)

    # batch=2, channels=4, spatial=32 (2x2 grid of 16x16 patches), float32.
    x_small = jax.random.uniform(k1, (2, 4, 32, 32), dtype=jnp.float32)
    loss_small = jax.block_until_ready(exposure_control_loss(x_small, use_pallas=True))
    ref_small = jax.block_until_ready(_reference_loss(x_small))
    assert jnp.allclose(loss_small, ref_small, rtol=1e-5, atol=1e-6), (loss_small, ref_small)

    # Larger bf16 input exercising the bf16 MXU streaming path.
    x_big = jax.random.uniform(k2, (2, 3, 128, 256), dtype=jnp.float32).astype(jnp.bfloat16)
    loss_big = jax.block_until_ready(exposure_control_loss(x_big, use_pallas=True))
    ref_big = jax.block_until_ready(_reference_loss(x_big))
    assert jnp.allclose(loss_big, ref_big, rtol=1e-4, atol=1e-5), (loss_big, ref_big)

    # B=1 with H not a multiple of the chosen tile: exercises the >=2-tile split
    # (v7x dual-TensorCore) and the masked partial-tile path.
    x_odd = jax.random.uniform(k3, (1, 3, 48, 128), dtype=jnp.float32)
    loss_odd = jax.block_until_ready(exposure_control_loss(x_odd, use_pallas=True))
    ref_odd = jax.block_until_ready(_reference_loss(x_odd))
    assert jnp.allclose(loss_odd, ref_odd, rtol=1e-5, atol=1e-6), (loss_odd, ref_odd)

    print("KERNEL_OK")
</pallas_src>

<mosaic_0001>
module attributes {stable_mosaic.version = 11 : i64} {
  func.func @_exposure_kernel(%arg0: i32, %arg1: i32, %arg2: memref<1x4x32x32xf32, #tpu.memory_space<vmem>>, %arg3: memref<2x128xf32, #tpu.memory_space<vmem>>, %arg4: memref<32x2xf32, #tpu.memory_space<vmem>>, %arg5: memref<1x1x8x128xf32, #tpu.memory_space<vmem>>) attributes {dimension_semantics = [#tpu.dimension_semantics<parallel>, #tpu.dimension_semantics<parallel>], iteration_bounds = array<i64: 2, 1>, scalar_prefetch = 0 : i64, scratch_operands = 0 : i64, tpu.core_type = #tpu.core_type<tc>, window_params = [{transform_indices = @transform_0, window_bounds = array<i64: 1, 4, 32, 32>}, {pipeline_mode = #tpu.pipeline_mode<synchronous>, transform_indices = @transform_1, window_bounds = array<i64: 2, 128>}, {pipeline_mode = #tpu.pipeline_mode<synchronous>, transform_indices = @transform_2, window_bounds = array<i64: 32, 2>}, {transform_indices = @transform_3, window_bounds = array<i64: 1, 1, 8, 128>}]} {
    %c0 = arith.constant 0 : index
    %c0_0 = arith.constant 0 : index
    %c0_1 = arith.constant 0 : index
    %c0_2 = arith.constant 0 : index
    %0 = vector.load %arg2[%c0, %c0_0, %c0_1, %c0_2] : memref<1x4x32x32xf32, #tpu.memory_space<vmem>>, vector<1x4x32x32xf32>
    %1 = vector.shape_cast %0 : vector<1x4x32x32xf32> to vector<4x32x32xf32>
    %2 = vector.shape_cast %1 : vector<4x32x32xf32> to vector<128x32xf32>
    %c0_3 = arith.constant 0 : index
    %c0_4 = arith.constant 0 : index
    %3 = vector.load %arg3[%c0_3, %c0_4] : memref<2x128xf32, #tpu.memory_space<vmem>>, vector<2x128xf32>
    %cst = arith.constant dense<0.000000e+00> : vector<2x32xf32>
    %4 = tpu.matmul %3, %2, %cst {dimension_numbers = #tpu.dot_dimension_numbers<[1], [0], [0], [1], [0, 0, 1, 1], [], []>} : vector<2x128xf32>, vector<128x32xf32>, vector<2x32xf32> -> vector<2x32xf32>
    %c0_5 = arith.constant 0 : index
    %c0_6 = arith.constant 0 : index
    %5 = vector.load %arg4[%c0_5, %c0_6] : memref<32x2xf32, #tpu.memory_space<vmem>>, vector<32x2xf32>
    %cst_7 = arith.constant dense<0.000000e+00> : vector<2x2xf32>
    %6 = tpu.matmul %4, %5, %cst_7 {dimension_numbers = #tpu.dot_dimension_numbers<[1], [0], [0], [1], [0, 0, 1, 1], [], []>} : vector<2x32xf32>, vector<32x2xf32>, vector<2x2xf32> -> vector<2x2xf32>
    %cst_8 = arith.constant 9.765625E-4 : f32
    %7 = vector.broadcast %cst_8 : f32 to vector<2x2xf32>
    %8 = arith.mulf %6, %7 : vector<2x2xf32>
    %cst_9 = arith.constant 6.000000e-01 : f32
    %9 = vector.broadcast %cst_9 : f32 to vector<2x2xf32>
    %10 = arith.subf %8, %9 : vector<2x2xf32>
    %11 = arith.mulf %10, %10 : vector<2x2xf32>
    %12 = vector.shape_cast %11 : vector<2x2xf32> to vector<1x2x2xf32>
    %cst_10 = arith.constant dense<0.000000e+00> : vector<1xf32>
    %13 = vector.multi_reduction <add>, %12, %cst_10 [1, 2] : vector<1x2x2xf32> to vector<1xf32>
    %14 = vector.shape_cast %13 : vector<1xf32> to vector<1x1x1xf32>
    %15 = vector.extract %14[0, 0, 0] : f32 from vector<1x1x1xf32>
    %16 = vector.broadcast %15 : f32 to vector<1x1x8x128xf32>
    %c0_11 = arith.constant 0 : index
    %c0_12 = arith.constant 0 : index
    %c0_13 = arith.constant 0 : index
    %c0_14 = arith.constant 0 : index
    %17 = vector.load %arg5[%c0_11, %c0_12, %c0_13, %c0_14] : memref<1x1x8x128xf32, #tpu.memory_space<vmem>>, vector<1x1x8x128xf32>
    tpu.vector_store %arg5[%c0_11, %c0_12, %c0_13, %c0_14], %16 {strides = array<i32>} : memref<1x1x8x128xf32, #tpu.memory_space<vmem>>, vector<1x1x8x128xf32>,
    return
  }
  func.func @transform_0(%arg0: i32, %arg1: i32) -> (i32, i32, i32, i32) {
    %c0_i32 = arith.constant 0 : i32
    %c0_i32_0 = arith.constant 0 : i32
    %c0_i32_1 = arith.constant 0 : i32
    return %arg0, %c0_i32, %arg1, %c0_i32_0 : i32, i32, i32, i32
  }
  func.func @transform_1(%arg0: i32, %arg1: i32) -> (i32, i32) {
    %c0_i32 = arith.constant 0 : i32
    %c0_i32_0 = arith.constant 0 : i32
    %c0_i32_1 = arith.constant 0 : i32
    return %c0_i32, %c0_i32_0 : i32, i32
  }
  func.func @transform_2(%arg0: i32, %arg1: i32) -> (i32, i32) {
    %c0_i32 = arith.constant 0 : i32
    %c0_i32_0 = arith.constant 0 : i32
    %c0_i32_1 = arith.constant 0 : i32
    return %c0_i32, %c0_i32_0 : i32, i32
  }
  func.func @transform_3(%arg0: i32, %arg1: i32) -> (i32, i32, i32, i32) {
    %c0_i32 = arith.constant 0 : i32
    %c0_i32_0 = arith.constant 0 : i32
    %c0_i32_1 = arith.constant 0 : i32
    return %arg0, %arg1, %c0_i32, %c0_i32_0 : i32, i32, i32, i32
  }
}

</mosaic_0001>

<bundles_post_ra>
// kernel: tpu_custom_call.1
= control target key start
LH: loop header
LB: loop body
LE: loop exit
PB: predicated region body
PF: predicated region fallthrough
CT: control target
= control target key end

     0   :  { %8 = vsyncpa [#allocation3], 0  ;;  %s1018_s0 = inlined_call_operand.hbm [shape: f32[2,4,32,32], index: 0, kind: input, shape index: {}]   ;;  %s1019_s1 = inlined_call_operand.vmem [shape: f32[2,128], index: 1, kind: input, shape index: {}]   ;;  %s1020_s2 = inlined_call_operand.vmem [shape: f32[32,2], index: 2, kind: input, shape index: {}]   ;;  %s1021_s3 = inlined_call_operand.hbm [shape: f32[2,1,8,128], index: 3, kind: output, shape index: {}]  }
   0x1   :  { %10 = vsyncpa [#allocation3 + $0x1], 0 }
   0x2   :  { %11 = vsyncpa [#allocation4], 0 }
   0x3   :  { %13 = vsyncpa [#allocation4 + $0x1], 0  ;;  %s811_s12 = smov 0   ;;  %s813_s13 = smov 0  }
   0x4   :  { %s815_s14 = smov 0   ;;  %s817_s15 = smov 0  }
   0x5   :  { %s819_s16 = smov 0   ;;  %s821_s17 = smov 0  }
   0x6 LB: > { %s486_s18 = sadd.s32 4294967295, %s782_s17   ;;  %s487_s19 = sadd.s32 4294967294, %s782_s17   ;;  %s782_s17 = sphi %s821_s17, %s19_s17   ;;  %s778_s16 = sphi %s819_s16, %s1036_s16   ;;  %s774_s15 = sphi %s817_s15, %s1035_s15   ;;  %s770_s14 = sphi %s815_s14, %s1034_s14   ;;  %s766_s13 = sphi %s813_s13, %s1033_s13   ;;  %s762_s12 = sphi %s811_s12, %s1032_s12  }
   0x7   : > { %s31_s20 = sadd.s32 1, %s778_s16  ;;  %s40_s21 = sadd.s32 1, %s770_s14 }
   0x8   : > { %p33_p0 = scmp.ge.s32.totalorder %s31_s20, 2  ;;  %p47_p1 = scmp.ne.s32.totalorder %s770_s14, %s766_s13 }
   0x9   : > { %p48_p2 = scmp.eq.s32.totalorder %s782_s17, 0  ;;  %p53_p3 = scmp.ne.s32.totalorder %s766_s13, %s762_s12 }
   0xa   : > { %s1038_s20 = smov (%p33_p0, %s31_s20), 0  ;;  %p54_p5 = scmp.eq.s32.totalorder %s486_s18, 0 }
   0xb   : > { %p852_p4 = por %p48_p2, %p47_p1  ;;  %s35_s23 = ssub.s32 %s778_s16, %s1038_s20 }
   0xc   : > { %p121_p6 = scmp.eq.s32.totalorder %s486_s18, 1  ;;  %p38_p7 = scmp.eq.s32.totalorder %s35_s23, 0 }
   0xd   : > { %p858_p8 = por %p54_p5, %p53_p3  ;;  %p127_p10 = scmp.eq.s32.totalorder %s487_s19, 1 }
   0xe   : > { %p862_p9 = por %p121_p6, %p47_p1  ;;  %p615_p13 = scmp.lt.s32.totalorder %s782_s17, 2 }
   0xf   : > { %s867_s26 = scalar_select %p38_p7, %s770_s14, %s40_s21  }
  0x10   : > { %s1025_s25 = scalar_select %p862_p9, 1, 0 }
  0x11   : > { %p869_p11 = por %p127_p10, %p53_p3  ;;  %s153_s28 = sand.u32 1, %s770_s14  }
  0x12   : > { %s490_s29 = sshll.u32 %s153_s28, 7  ;;  %s502_s30 = sshll.u32 %s778_s16, 11 }
  0x13   : > { %s1026_s27 = scalar_select %p869_p11, 1, 0 }
  0x14   : > { %s880_s6 = scalar_lea.hbm %s1018_s0, %s502_s30  ;;  %s157_s7 = scalar_lea.vmem [#allocation2], %s490_s29 }
  0x15   : > { %s166_s8 = sshll.u32 %s157_s7, 4  ;;  %p886_p0 = pnand %p615_p13, %p852_p4  ;;  %s882_s8 = int_to_ptr.vmem [resolvable:$true] %s166_s8 }
  0x16   : > { %s891_s10 = scalar_lea.sflag [#allocation3], %s153_s28  ;;  %s670_s11 = scalar_lea.hbm %s880_s6, 2048 }
  0x17   : > { %p671_p2 = scmp.ne.s32.totalorder %s880_s6, %s670_s11  ;;  %p672_p3 = pneg %p886_p0 }
  0x18   : > { %s675_s21 = scalar_lea.hbm %s1018_s0, 4096  ;;  %p676_p4 = scmp.lt.u32.totalorder %s880_s6, %s1018_s0 }
  0x19   : > { %p673_p5 = pnand %p672_p3, %p671_p2  ;;  %p677_p7 = scmp.lt.u32.totalorder %s675_s21, %s670_s11 }
  0x1a   : > { %p679_p13 = scmp.lt.u32.totalorder %s670_s11, %s880_s6 }
  0x1b   : > { %p674_p6 = pneg %p673_p5  ;;  %p678_p10 = por %p677_p7, %p676_p4 }
  0x1d   : > { %p680_p12 = por %p679_p13, %p678_p10 }
  0x1f   : > { %p681_p1 = pnand %p680_p12, %p674_p6 }
  0x21   : > { %684 = shalt.err (!%p681_p1)
}
  0x22   : > { %s685_s28 = scalar_lea.vmem %s882_s8, 2048  ;;  %s784_s29 = smov [#allocation2]  }
  0x23   : > { %p686_p2 = scmp.ne.s32.totalorder %s882_s8, %s685_s28  ;;  %s690_s30 = sshll.u32 %s784_s29, 4  ;;  %s691_s30 = int_to_ptr.vmem [resolvable:$false] %s690_s30 }
  0x24   : > { %s692_s4 = scalar_lea.vmem %s691_s30, 4096  ;;  %p693_p9 = scmp.lt.s32.totalorder %s882_s8, %s691_s30 }
  0x25   : > { %p688_p5 = pnand %p686_p2, %p672_p3  ;;  %p694_p4 = scmp.lt.s32.totalorder %s692_s4, %s685_s28 }
  0x27   : > { %p689_p11 = pneg %p688_p5  ;;  %p695_p7 = por %p694_p4, %p693_p9 }
  0x29   : > { %p696_p10 = pnand %p695_p7, %p689_p11 }
  0x2b   : > { %699 = shalt.err (!%p696_p10)
}
  0x2c   : > { %s785_s5 = smov 128   ;;  %s786_s7 = smov 8  }
  0x2d   : > { %610 = dma.hbm_to_vmem [thread:$0]  (!%p886_p0), %s880_s6, 2048, %s882_s8, %s891_s10, %s785_s5, %s785_s5, %s786_s7  }
  0x2e   : > { %p174_p12 = scmp.lt.s32.totalorder %s782_s17, 3  ;;  %p1028_p1 = scmp.ge.s32.totalorder %s782_s17, 1 }
  0x30   : > { %p175_p3 = pnand %p1028_p1, %p174_p12 }
  0x31   : > { %s923_s11 = sand.u32 (!%p175_p3), 1, %s766_s13  }
  0x32   : > { %178 = sbr.rel (%p175_p3) target bundleno = 742 (0x2e6), region = 32  ;;  %s494_s18 = sshll.u32 (!%p175_p3), %s923_s11, 7 }
  0x33   : > { %s181_s19 = scalar_lea.sflag (!%p175_p3), [#allocation3], %s923_s11  ;;  %s927_s21 = scalar_lea.vmem (!%p175_p3), [#allocation2], %s494_s18 }
  0x39   : > { %753 = dma.done.wait (%p858_p8), %s181_s19, 2048  }
  0x3a   : > { %755 = vsyncadd (%p858_p8), %s181_s19, 4294965248  ;;  %v787_v0 = vmov 0.0|0.0   ;;  %vm788_vm0 = vmmov 0   ;;  %v789_v1 = vmov 0.0   ;;  %v208_v2 = vld [vmem:[%s927_s21] sm:$0xff]  ;;  %v209_v3 = vld [vmem:[%s927_s21 + $0x8] sm:$0xff] }
  0x3b   : > { %571 = vmatprep.subr.bf16.mxu0 %v787_v0  ;;  %557 = vmatprep.mubr.msk.f32.mxu0 %vm788_vm0, %v789_v1  ;;  %v210_v4 = vld [vmem:[%s927_s21 + $0x10] sm:$0xff]  ;;  %v572_v5 = vpack.c.bf16 %v209_v3, %v208_v2  ;;  %v211_v6 = vld [vmem:[%s927_s21 + $0x18] sm:$0xff]  ;;  %v212_v8 = vld [vmem:[%s927_s21 + $0x20] sm:$0xff]  ;;  %vm299_vm1 = vcmask 261120   ;;  %vm376_vm2 = vcmask 9216   ;;  %s495_s4 = sshll.u32 %s923_s11, 3 }
  0x3c   : > { %595 = vmatprep.subr.bf16.mxu1 %v787_v0  ;;  %568 = vmatprep.mubr.msk.f32.mxu1 %vm788_vm0, %v789_v1  ;;  %v575_v7 = vpack.c.bf16 %v211_v6, %v210_v4  ;;  %v213_v9 = vld [vmem:[%s927_s21 + $0x28] sm:$0xff]  ;;  %v295_v10 = vld [vmem:[%s1020_s2] sm:$0xff]  ;;  %v297_v12 = vld [vmem:[%s1020_s2 + $0x10] sm:$0xff]  ;;  %s206_s5 = scalar_lea.vmem [#allocation5], %s495_s4  ;;  %s499_s18 = sshll.u32 %s774_s15, 7 }
  0x3d   : > { %573 = vmatpush3.bf16.msra.mxu0 %v572_v5  ;;  %v296_v11 = vld [vmem:[%s1020_s2 + $0x8] sm:$0xff]  ;;  %v298_v13 = vld [vmem:[%s1020_s2 + $0x18] sm:$0xff]  ;;  %v578_v14 = vpack.c.bf16 %v213_v9, %v212_v8  ;;  %v214_v16 = vld [vmem:[%s927_s21 + $0x30] sm:$0xff]  ;;  %s404_s7 = sshll.u32 %s206_s5, 4  ;;  %s971_s6 = scalar_lea.hbm %s1021_s3, %s499_s18  ;;  %s966_s7 = int_to_ptr.vmem [resolvable:$true] %s404_s7 }
  0x3e   : > { %574 = vmatprep.subr.bf16.mxu0 %v787_v0  ;;  %v596_v15 = vpack.c.bf16 %v296_v11, %v295_v10  ;;  %v215_v17 = vld [vmem:[%s927_s21 + $0x38] sm:$0xff]  ;;  %v599_v18 = vpack.c.bf16 %v298_v13, %v297_v12  ;;  %v216_v20 = vld [vmem:[%s927_s21 + $0x40] sm:$0xff]  ;;  %v217_v21 = vld [vmem:[%s927_s21 + $0x48] sm:$0xff]  ;;  %s390_s8 = scalar_lea.sflag [#allocation4], %s923_s11  ;;  %s700_s9 = scalar_lea.vmem %s966_s7, 128 }
  0x3f   : > { %v581_v19 = vpack.c.bf16 %v215_v17, %v214_v16  ;;  %v584_v22 = vpack.c.bf16 %v217_v21, %v216_v20  ;;  %v218_v23 = vld [vmem:[%s927_s21 + $0x50] sm:$0xff]  ;;  %v219_v24 = vld [vmem:[%s927_s21 + $0x58] sm:$0xff]  ;;  %v220_v26 = vld [vmem:[%s927_s21 + $0x60] sm:$0xff]  ;;  %p701_p8 = scmp.ne.s32.totalorder %s966_s7, %s700_s9  ;;  %p1029_p9 = scmp.ne.s32.totalorder %s1025_s25, 0 }
  0x40   : > { %597 = vmatpush3.bf16.msra.mxu1 %v596_v15  ;;  %v587_v25 = vpack.c.bf16 %v219_v24, %v218_v23  ;;  %v221_v27 = vld [vmem:[%s927_s21 + $0x68] sm:$0xff]  ;;  %v222_v29 = vld [vmem:[%s927_s21 + $0x70] sm:$0xff]  ;;  %v223_v30 = vld [vmem:[%s927_s21 + $0x78] sm:$0xff]  ;;  %s790_s15 = smov [#allocation5]  }
  0x41   : > { %576 = vmatpush3.bf16.msra.mxu0 %v575_v7  ;;  %598 = vmatprep.subr.bf16.mxu1 %v787_v0  ;;  %v590_v28 = vpack.c.bf16 %v221_v27, %v220_v26  ;;  %v593_v31 = vpack.c.bf16 %v223_v30, %v222_v29  ;;  %v224_v32 = vld [vmem:[%s1019_s1] sm:$0x3]  ;;  %p702_p11 = pnand %p701_p8, %p1029_p9  ;;  %s704_s10 = sshll.u32 %s790_s15, 4  ;;  %s705_s10 = int_to_ptr.vmem [resolvable:$false] %s704_s10 }
  0x42   : > { %577 = vmatprep.subr.bf16.mxu0 %v787_v0  ;;  %s706_s22 = scalar_lea.vmem %s705_s10, 256  ;;  %p707_p6 = scmp.lt.s32.totalorder %s966_s7, %s705_s10 }
  0x43   : > { %p703_p0 = pneg %p702_p11  ;;  %p708_p13 = scmp.lt.s32.totalorder %s706_s22, %s700_s9 }
  0x44   : > { %600 = vmatpush3.bf16.msra.mxu1 %v599_v18 }
  0x45   : > { %579 = vmatpush3.bf16.msra.mxu0 %v578_v14  ;;  %p709_p2 = por %p708_p13, %p707_p6 }
  0x46   : > { %580 = vmatprep.subr.bf16.mxu0 %v787_v0 }
  0x47   : > { %p710_p5 = pnand %p709_p2, %p703_p0 }
  0x49   : > { %582 = vmatpush3.bf16.msra.mxu0 %v581_v19 }
  0x4a   : > { %583 = vmatprep.subr.bf16.mxu0 %v787_v0 }
  0x4d   : > { %585 = vmatpush3.bf16.msra.mxu0 %v584_v22 }
  0x4e   : > { %586 = vmatprep.subr.bf16.mxu0 %v787_v0 }
  0x51   : > { %588 = vmatpush3.bf16.msra.mxu0 %v587_v25 }
  0x52   : > { %589 = vmatprep.subr.bf16.mxu0 %v787_v0 }
  0x55   : > { %591 = vmatpush3.bf16.msra.mxu0 %v590_v28 }
  0x56   : > { %592 = vmatprep.subr.bf16.mxu0 %v787_v0 }
  0x59   : > { %594 = vmatpush3.bf16.msra.mxu0 %v593_v31 }
  0x5c   : > { %558 = vmatmul.mubr.f32.vlgmr.msra.gmra.mrb[0].mxu0 %v224_v32 }
 0x12f   : > { %v291_v33 = vpop.f32.mrb[0].mxu0 }
 0x130   : > { %v559_v34 = vpop.f32.mrb[1].mxu0  ;;  %569 = vmatmul.mubr.msk.f32.vlgmr.msra.gmra.mrb[0].mxu1 %vm299_vm1, %v291_v33 }
 0x203   : > { %v369_v35 = vpop.f32.mrb[0].mxu1 }
 0x204   : > { %v373_v36 = vmul.f32 0.0009765625, %v369_v35  ;;  %v570_v37 = vpop.f32.mrb[1].mxu1 }
 0x206   : > { %v497_v38 = vadd.f32 -0.6, %v373_v36 }
 0x208   : > { %v375_v39 = vmul.f32 %v497_v38, %v497_v38 }
 0x20a   : > { %v377_v40 = vsel %vm376_vm2, %v375_v39, 0.0 }
 0x20b   : > { %378 = vadd.xlane.f32.xlu0 %v377_v40 }
 0x298   : > { %v379_v41 = vpop.xlane.xlu0 %378 }
 0x299   : > { %v380_v42 = vrot.slane %v379_v41, 4 }
 0x29b   : > { %v381_v43 = vadd.f32 %v380_v42, %v379_v41 }
 0x29d   : > { %v382_v44 = vrot.slane %v381_v43, 2 }
 0x29f   : > { %v383_v45 = vadd.f32 %v382_v44, %v381_v43 }
 0x2a1   : > { %v384_v46 = vrot.slane %v383_v45, 1 }
 0x2a3   : > { %v385_v47 = vadd.f32 %v384_v46, %v383_v45 }
 0x2a5   : > { %601 = vpush %v385_v47 }
 0x2d6   : > { %s602_s19 = spop %601 }
 0x2d7   : > { %v387_v48 = vstv %s602_s19 }
 0x2d8   : > { %388 = vst [vmem:[%s206_s5] sm:$0xff] %v387_v48 }
 0x2d9   : > { %713 = shalt.err (!%p710_p5)
}
 0x2da   : > { %s714_s11 = scalar_lea.hbm %s971_s6, 128  ;;  %s718_s29 = scalar_lea.hbm %s1021_s3, 256 }
 0x2db   : > { %p715_p4 = scmp.ne.s32.totalorder %s971_s6, %s714_s11  ;;  %p719_p12 = scmp.lt.u32.totalorder %s971_s6, %s1021_s3 }
 0x2dc   : > { %p720_p1 = scmp.lt.u32.totalorder %s718_s29, %s714_s11  ;;  %p722_p8 = scmp.lt.u32.totalorder %s714_s11, %s971_s6 }
 0x2dd   : > { %p716_p7 = pnand %p715_p4, %p1029_p9 }
 0x2de   : > { %p721_p3 = por %p720_p1, %p719_p12 }
 0x2df   : > { %p717_p10 = pneg %p716_p7 }
 0x2e0   : > { %p723_p11 = por %p722_p8, %p721_p3 }
 0x2e2   : > { %p724_p0 = pnand %p723_p11, %p717_p10 }
 0x2e4   : > { %727 = shalt.err (!%p724_p0)
}
 0x2e5   : > { %605 = dma.vmem_to_hbm [thread:$0]  (%p1029_p9), %s966_s7, 128, %s971_s6, %s390_s8  }
 0x2e6 PF: > { %s416_s5 = sand.u32 1, %s762_s12   ;;  %p1030_p6 = scmp.ne.s32.totalorder %s1026_s27, 0 }
 0x2e7   : > { %p1031_p13 = scmp.ge.s32.totalorder %s782_s17, 2  ;;  %s417_s18 = scalar_lea.sflag [#allocation4], %s416_s5 }
 0x2e9   : > { %p612_p2 = pnand %p1031_p13, %p1030_p6 }
 0x2eb   : > { %757 = dma.done.wait (!%p612_p2), %s417_s18, 128  }
 0x2ec   : > { %759 = vsyncadd (!%p612_p2), %s417_s18, 4294967168  ;;  %s19_s17 = sadd.s32 1, %s782_s17   ;;  %s1032_s12 = smov %s766_s13 }
 0x2ed   : > { %p16_p5 = scmp.ge.s32.totalorder %s19_s17, 4   ;;  %s1033_s13 = smov %s770_s14 }
 0x2ee   : > { %s1034_s14 = smov %s867_s26  ;;  %s1035_s15 = smov %s778_s16 }
 0x2ef   : > { %s1036_s16 = smov %s1038_s20  ;;  %18 = sbr.rel (!%p16_p5) target bundleno = 6 (0x6), region = 77 }
 0x2f6   :  { %422 = vsyncpa [#allocation3], 1 }
 0x2f7   :  { %424 = vsyncpa [#allocation3 + $0x1], 1 }
 0x2f8   :  { %425 = vsyncpa [#allocation4], 1 }
 0x2f9   :  { %427 = vsyncpa [#allocation4 + $0x1], 1 }

</bundles_post_ra>
